<compile_context>
chip_gen: v6e
topology: v6e:2x2x1
jax: 0.10.0
libtpu: 0.0.40
codegen_flags: <defaults>
</compile_context>

<pallas_src>
import functools

import jax
import jax.numpy as jnp
from jax.experimental import pallas as pl
from jax.experimental.pallas import tpu as pltpu

MIN_VALUE = -1.0
MAX_VALUE = 1.0

IN_FEATURES = 10
OUT_FEATURES = 4

# Row tile for the gridded (large-batch) path. 2048 rows => padded x tile
# (2048, 128) f32 = 1 MiB; double-buffered x + out ~= 4 MiB, well under v5e's
# 16 MiB default scoped VMEM and v6e/v7x's 32 MiB.
_TILE_M = 2048
# Single whole-array (no grid) invocation up to this many rows (padded x + out
# ~= 4 MiB at 4096 rows).  Above this, grid_m = cdiv(M, 2048) >= 3, so the
# "parallel" M axis gives both v7x TensorCores work.
_NO_GRID_MAX_M = 4096


def _linear_clamp_kernel(x_ref, w_ref, b_ref, o_ref):
    # x_ref: (TM, K), w_ref: (K, N), b_ref: (1, N), o_ref: (TM, N)
    y = jnp.dot(x_ref[...], w_ref[...], preferred_element_type=jnp.float32)  # MXU
    y = y + b_ref[...]                          # broadcast bias
    y = jnp.maximum(y, MIN_VALUE)               # clamp_min
    y = jnp.minimum(y, MAX_VALUE)               # clamp_max
    o_ref[...] = y.astype(o_ref.dtype)


def _linear_clamp_lane_dense_kernel(xt_ref, w_ref, b_ref, ot_ref):
    # Lane-dense / transposed formulation (pure VPU, no MXU):
    #   xt_ref: (K, TM) VMEM (lane-dense rows), w_ref: (N, K) SMEM,
    #   b_ref: (N,) SMEM, ot_ref: (N, TM) VMEM.
    # y[n, :] = clamp(sum_k w[n, k] * x[k, :] + b[n]) -> 40 scalar*vector FMAs
    # per tile, fully lane-dense loads and unmasked full-lane stores.
    x = xt_ref[...]                              # (K, TM)
    n_out, k_in = w_ref.shape
    for n in range(n_out):                       # static, unrolled (N = 4)
        acc = jnp.full((1, x.shape[1]), b_ref[n], dtype=jnp.float32)
        for k in range(k_in):                    # static, unrolled (K = 10)
            acc = acc + w_ref[n, k] * x[k:k + 1, :]
        acc = jnp.minimum(jnp.maximum(acc, MIN_VALUE), MAX_VALUE)
        ot_ref[n:n + 1, :] = acc.astype(ot_ref.dtype)


def init_params(key, in_features=IN_FEATURES, out_features=OUT_FEATURES):
    """PyTorch-style Linear init; all kernel-friendly layouts are built once here
    (never in the per-call path)."""
    kw, kb = jax.random.split(key)
    bound = 1.0 / float(jnp.sqrt(jnp.float32(in_features)))
    w_nk = jax.random.uniform(kw, (out_features, in_features),
                              minval=-bound, maxval=bound, dtype=jnp.float32)
    b = jax.random.uniform(kb, (out_features,),
                           minval=-bound, maxval=bound, dtype=jnp.float32)
    return {
        "w_nk": w_nk,                            # (N, K): torch layout, lane-dense path
        "b": b,                                  # (N,)
        "w_kn": jnp.asarray(w_nk.T),             # (K, N): standard-layout path
        "b2d": b.reshape(1, out_features),       # (1, N)
    }


@functools.partial(jax.jit, static_argnames=("tile_m",))
def linear_clamp(x, w_kn, b2d, *, tile_m=_TILE_M):
    """Module-equivalent interface. x: (M, K) f32 -> (M, N) f32."""
    M, K = x.shape
    N = w_kn.shape[1]
    # bytes_accessed reflects padded (lane = 128) HBM traffic for x and out,
    # plus the (sublane/lane padded) weight and bias tiles.
    cost = pl.CostEstimate(
        flops=2 * M * K * N,
        transcendentals=0,
        bytes_accessed=4 * (M * 128 + M * 128 + 16 * 128 + 8 * 128),
    )

    if M <= _NO_GRID_MAX_M:
        # Small/medium batch: no grid, no pipelining bookkeeping — a single
        # VMEM-resident block per operand.
        return pl.pallas_call(
            _linear_clamp_kernel,
            out_shape=jax.ShapeDtypeStruct((M, N), jnp.float32),
            in_specs=[
                pl.BlockSpec(memory_space=pltpu.MemorySpace.VMEM),
                pl.BlockSpec(memory_space=pltpu.MemorySpace.VMEM),
                pl.BlockSpec(memory_space=pltpu.MemorySpace.VMEM),
            ],
            out_specs=pl.BlockSpec(memory_space=pltpu.MemorySpace.VMEM),
            cost_estimate=cost,
        )(x, w_kn, b2d)

    # Large batch: tile M; weight/bias stay resident. "parallel" lets v7x
    # shard grid steps across both TensorCores (grid_m >= 3 here).
    grid_m = pl.cdiv(M, tile_m)
    return pl.pallas_call(
        _linear_clamp_kernel,
        out_shape=jax.ShapeDtypeStruct((M, N), jnp.float32),
        grid=(grid_m,),
        in_specs=[
            pl.BlockSpec((tile_m, K), lambda i: (i, 0)),
            pl.BlockSpec((K, N), lambda i: (0, 0)),
            pl.BlockSpec((1, N), lambda i: (0, 0)),
        ],
        out_specs=pl.BlockSpec((tile_m, N), lambda i: (i, 0)),
        compiler_params=pltpu.CompilerParams(
            dimension_semantics=("parallel",),
        ),
        cost_estimate=cost,
    )(x, w_kn, b2d)


@functools.partial(jax.jit, static_argnames=("tile_m",))
def linear_clamp_lane_dense(x_t, w_nk, b, *, tile_m=_TILE_M):
    """Lane-dense fast path for fused / feature-major producers.

    x_t: (K, M) f32, w_nk: (N, K) f32, b: (N,) f32 -> y_t: (N, M) f32.
    No lane padding on input or output, unmasked stores, pure VPU compute.
    """
    K, M = x_t.shape
    N = w_nk.shape[0]
    cost = pl.CostEstimate(
        flops=2 * M * K * N,
        transcendentals=0,
        bytes_accessed=4 * (K * M + N * M + N * K + N),
    )

    if M <= _NO_GRID_MAX_M:
        return pl.pallas_call(
            _linear_clamp_lane_dense_kernel,
            out_shape=jax.ShapeDtypeStruct((N, M), jnp.float32),
            in_specs=[
                pl.BlockSpec(memory_space=pltpu.MemorySpace.VMEM),
                pl.BlockSpec(memory_space=pltpu.MemorySpace.SMEM),
                pl.BlockSpec(memory_space=pltpu.MemorySpace.SMEM),
            ],
            out_specs=pl.BlockSpec(memory_space=pltpu.MemorySpace.VMEM),
            cost_estimate=cost,
        )(x_t, w_nk, b)

    grid_m = pl.cdiv(M, tile_m)
    return pl.pallas_call(
        _linear_clamp_lane_dense_kernel,
        out_shape=jax.ShapeDtypeStruct((N, M), jnp.float32),
        grid=(grid_m,),
        in_specs=[
            pl.BlockSpec((K, tile_m), lambda i: (0, i)),
            pl.BlockSpec(memory_space=pltpu.MemorySpace.SMEM),
            pl.BlockSpec(memory_space=pltpu.MemorySpace.SMEM),
        ],
        out_specs=pl.BlockSpec((N, tile_m), lambda i: (0, i)),
        compiler_params=pltpu.CompilerParams(
            dimension_semantics=("parallel",),
        ),
        cost_estimate=cost,
    )(x_t, w_nk, b)


if __name__ == "__main__":
    key = jax.random.PRNGKey(0)
    kx, kparams, kx_big = jax.random.split(key, 3)

    params = init_params(kparams)

    # Tolerance covers MXU bf16-pass f32 matmul vs exact-f32 VPU accumulation.
    ATOL = 5e-3

    def reference(x):
        y = jnp.dot(x, params["w_kn"], precision=jax.lax.Precision.HIGHEST)
        return jnp.clip(y + params["b2d"], MIN_VALUE, MAX_VALUE)

    # --- Module-equivalent path, small batch (typical usage) ---
    batch = 8
    x = jax.random.normal(kx, (batch, IN_FEATURES), dtype=jnp.float32)
    out = linear_clamp(x, params["w_kn"], params["b2d"])
    jax.block_until_ready(out)
    ref = reference(x)
    assert out.shape == (batch, OUT_FEATURES)
    assert jnp.allclose(out, ref, atol=ATOL, rtol=ATOL)

    # --- Gridded large-batch path (grid_m = 3, masked remainder tile) ---
    big_batch = 4608  # 2 full 2048-row tiles + 512-row remainder
    x_big = jax.random.normal(kx_big, (big_batch, IN_FEATURES), dtype=jnp.float32)
    out_big = linear_clamp(x_big, params["w_kn"], params["b2d"])
    jax.block_until_ready(out_big)
    ref_big = reference(x_big)
    assert out_big.shape == (big_batch, OUT_FEATURES)
    assert jnp.allclose(out_big, ref_big, atol=ATOL, rtol=ATOL)

    # --- Lane-dense transposed fast path (for fused / feature-major callers) ---
    out_t = linear_clamp_lane_dense(x.T, params["w_nk"], params["b"])
    jax.block_until_ready(out_t)
    assert out_t.shape == (OUT_FEATURES, batch)
    assert jnp.allclose(out_t, ref.T, atol=ATOL, rtol=ATOL)

    out_t_big = linear_clamp_lane_dense(x_big.T, params["w_nk"], params["b"])
    jax.block_until_ready(out_t_big)
    assert jnp.allclose(out_t_big, ref_big.T, atol=ATOL, rtol=ATOL)

    print("KERNEL_OK")
</pallas_src>

<mosaic_0001>
module attributes {stable_mosaic.version = 11 : i64} {
  func.func @_linear_clamp_kernel(%arg0: memref<8x10xf32, #tpu.memory_space<vmem>>, %arg1: memref<10x4xf32, #tpu.memory_space<vmem>>, %arg2: memref<1x4xf32, #tpu.memory_space<vmem>>, %arg3: memref<8x4xf32, #tpu.memory_space<vmem>>) attributes {dimension_semantics = [], scalar_prefetch = 0 : i64, scratch_operands = 0 : i64, tpu.core_type = #tpu.core_type<tc>} {
    %c0 = arith.constant 0 : index
    %c0_0 = arith.constant 0 : index
    %0 = vector.load %arg0[%c0, %c0_0] : memref<8x10xf32, #tpu.memory_space<vmem>>, vector<8x10xf32>
    %c0_1 = arith.constant 0 : index
    %c0_2 = arith.constant 0 : index
    %1 = vector.load %arg1[%c0_1, %c0_2] : memref<10x4xf32, #tpu.memory_space<vmem>>, vector<10x4xf32>
    %cst = arith.constant dense<0.000000e+00> : vector<8x4xf32>
    %2 = tpu.matmul %0, %1, %cst {dimension_numbers = #tpu.dot_dimension_numbers<[1], [0], [0], [1], [0, 0, 1, 1], [], []>} : vector<8x10xf32>, vector<10x4xf32>, vector<8x4xf32> -> vector<8x4xf32>
    %c0_3 = arith.constant 0 : index
    %c0_4 = arith.constant 0 : index
    %3 = vector.load %arg2[%c0_3, %c0_4] : memref<1x4xf32, #tpu.memory_space<vmem>>, vector<1x4xf32>
    %4 = vector.broadcast %3 : vector<1x4xf32> to vector<8x4xf32>
    %5 = arith.addf %2, %4 : vector<8x4xf32>
    %cst_5 = arith.constant -1.000000e+00 : f32
    %6 = vector.broadcast %cst_5 : f32 to vector<8x4xf32>
    %7 = arith.maximumf %5, %6 : vector<8x4xf32>
    %cst_6 = arith.constant 1.000000e+00 : f32
    %8 = vector.broadcast %cst_6 : f32 to vector<8x4xf32>
    %9 = arith.minimumf %7, %8 : vector<8x4xf32>
    %c0_7 = arith.constant 0 : index
    %c0_8 = arith.constant 0 : index
    %10 = vector.load %arg3[%c0_7, %c0_8] : memref<8x4xf32, #tpu.memory_space<vmem>>, vector<8x4xf32>
    tpu.vector_store %arg3[%c0_7, %c0_8], %9 {strides = array<i32>} : memref<8x4xf32, #tpu.memory_space<vmem>>, vector<8x4xf32>,
    return
  }
}

</mosaic_0001>

<bundles_post_ra>
// kernel: linear_clamp.1
= control target key start
LH: loop header
LB: loop body
LE: loop exit
PB: predicated region body
PF: predicated region fallthrough
CT: control target
= control target key end

     0   :  { %vm28_vm0 = vcmask 1041408   ;;  %v126_v0 = vmov 0.0   ;;  %vm127_vm1 = vmmov 0   ;;  %vm24_vm2 = vcmask 80896   ;;  %s163_s1 = inlined_call_operand.vmem [shape: f32[10,4], index: 1, kind: input, shape index: {}]   ;;  %s164_s0 = inlined_call_operand.vmem [shape: f32[8,10], index: 0, kind: input, shape index: {}]   ;;  %s165_s2 = inlined_call_operand.vmem [shape: f32[1,4], index: 2, kind: input, shape index: {}]   ;;  %s166_s3 = inlined_call_operand.vmem [shape: f32[8,4], index: 3, kind: output, shape index: {}]  }
   0x1   :  { %117 = vmatprep.subr.mxu0 %v126_v0  ;;  %v16_v1 = vld [vmem:[%s163_s1 + $0x8] sm:$0x3]  ;;  %v15_v2 = vld [vmem:[%s163_s1] sm:$0xff]  ;;  %121 = vmatprep.mubr.msk.f32.mxu0 %vm127_vm1, %v126_v0  ;;  %vm104_vm3 = vcmask 31744  }
   0x2   :  { %118 = vmatpush3.msk.msra.mxu0 %vm28_vm0, %v16_v1  ;;  %v14_v3 = vld [vmem:[%s164_s0] sm:$0xff] }
   0x3   :  { %119 = vmatprep.subr.mxu0 %v126_v0  ;;  %v110_v4 = vld [vmem:[%s165_s2] ss:$0 sm:$0xff] }
   0x4   :  { %120 = vmatpush3.msra.mxu0 %v15_v2 }
   0x5   :  { %122 = vmatmul.mubr.msk.f32.vlgmr.msra.gmra.mxu0 %vm24_vm2, %v14_v3 }
  0xc5   :  { %v98_v5 = vpop.f32.mrf.mxu0 }
  0xc6   :  { %v99_v6 = vadd.f32 %v110_v4, %v98_v5 }
  0xc7   :  { %v123_v7 = vpop.f32.mrf.mxu0 }
  0xc8   :  { %v113_v8 = vclamps-f32 %v99_v6, 1.0 }
  0xca   :  { %105 = vst.msk [vmem:[%s166_s3] sm:$0xff] %vm104_vm3, %v113_v8 }

</bundles_post_ra>
